<compile_context>
chip_gen: v7x
topology: tpu7x:2x2x1
jax: 0.10.0
libtpu: 0.0.40
codegen_flags: <defaults>
</compile_context>

<pallas_src>
import jax
import jax.numpy as jnp
from jax.experimental import pallas as pl
from jax.experimental.pallas import tpu as pltpu


def _round_up(x, m):
    return (x + m - 1) // m * m


def _vmem_limit_bytes(frac=0.8, fallback=48 * 2**20):
    # Generation-aware scoped-VMEM limit (v5e/v6e: 128 MiB, v7x: 64 MiB phys).
    try:
        cap = int(pltpu.get_tpu_info().vmem_capacity_bytes)
        return int(cap * frac)
    except Exception:
        return fallback


# ---- Phase A: T = De^-1 * sum_i  H^T[:, i] @ (dvs_i * (X_i @ W)) -------------
def _phase_a_kernel(ht_ref, x_ref, dvs_ref, w_ref, dei_ref, t_ref):
    i = pl.program_id(0)

    @pl.when(i == 0)
    def _():
        t_ref[...] = jnp.zeros_like(t_ref)

    xw = jnp.dot(x_ref[...], w_ref[...], preferred_element_type=jnp.float32)
    y = dvs_ref[...] * xw                                   # (tn, Fout)
    ht = ht_ref[...].astype(jnp.float32)                    # (Ep, tn) bf16->f32
    t_ref[...] += jnp.dot(ht, y, preferred_element_type=jnp.float32)

    @pl.when(i == pl.num_programs(0) - 1)
    def _():
        t_ref[...] *= dei_ref[...]                          # fold De^-1 once


# ---- Phase M: h1_i = relu(dvs_i*(H_i@T1)+b1); T2 += H^T[:,i]@(dvs_i*(h1_i@W2))
def _phase_m_kernel(h_ref, ht_ref, dvs_ref, t1_ref, b1_ref, w2_ref, dei_ref,
                    t2_ref):
    i = pl.program_id(0)

    @pl.when(i == 0)
    def _():
        t2_ref[...] = jnp.zeros_like(t2_ref)

    dvs = dvs_ref[...]                                      # (tn, 1)
    h = h_ref[...].astype(jnp.float32)                      # (tn, Ep)
    z = jnp.dot(h, t1_ref[...], preferred_element_type=jnp.float32)
    h1 = jnp.maximum(dvs * z + b1_ref[...], 0.0)            # layer-1 ReLU tile
    y2 = dvs * jnp.dot(h1, w2_ref[...], preferred_element_type=jnp.float32)
    ht = ht_ref[...].astype(jnp.float32)                    # (Ep, tn)
    t2_ref[...] += jnp.dot(ht, y2, preferred_element_type=jnp.float32)

    @pl.when(i == pl.num_programs(0) - 1)
    def _():
        t2_ref[...] *= dei_ref[...]


# ---- Phase B: out_i = relu(dvs_i * (H_i @ T) + b) ----------------------------
def _phase_b_kernel(h_ref, dvs_ref, t_ref, b_ref, o_ref):
    h = h_ref[...].astype(jnp.float32)
    z = jnp.dot(h, t_ref[...], preferred_element_type=jnp.float32)
    o_ref[...] = jnp.maximum(dvs_ref[...] * z + b_ref[...], 0.0)


def branch_hgcn(X, H, W1, b1, W2, b2, *, tile_n=128):
    N, Fin = X.shape
    E = H.shape[1]
    hid = W1.shape[1]
    out_dim = W2.shape[1]

    f32 = jnp.float32
    # Node tile (sublane-aligned); lane dims padded to 128 so every vreg and the
    # output store is lane-dense.  Zero padding is exact for this operator.
    tn = min(tile_n, _round_up(N, 8))
    Np = _round_up(N, tn)
    Ep = _round_up(E, 128)
    Fip = _round_up(Fin, 128)
    Hdp = _round_up(hid, 128)
    Odp = _round_up(out_dim, 128)
    nt = Np // tn

    Xp = jnp.pad(X.astype(f32), ((0, Np - N), (0, Fip - Fin)))
    Hp = jnp.pad(H.astype(f32), ((0, Np - N), (0, Ep - E)))
    Hb = Hp.astype(jnp.bfloat16)        # exact for 0/1 incidence, half traffic
    HTb = Hb.T                          # single XLA transpose (bf16)
    W1p = jnp.pad(W1.astype(f32), ((0, Fip - Fin), (0, Hdp - hid)))
    b1p = jnp.pad(b1.astype(f32).reshape(1, -1), ((0, 0), (0, Hdp - hid)))
    W2p = jnp.pad(W2.astype(f32), ((0, Hdp - hid), (0, Odp - out_dim)))
    b2p = jnp.pad(b2.astype(f32).reshape(1, -1), ((0, 0), (0, Odp - out_dim)))

    # Degree normalizations (diag inverses -> elementwise scales), computed once.
    dv = jnp.sum(Hp, axis=1, keepdims=True)                 # (Np, 1)
    de = jnp.sum(Hp, axis=0).reshape(Ep, 1)                 # (Ep, 1)
    dvs = 1.0 / jnp.sqrt(dv + 1e-5)
    dei = 1.0 / (de + 1e-5)

    vmem_limit = _vmem_limit_bytes()

    # Streamed / resident block specs.
    ht_spec = pl.BlockSpec((Ep, tn), lambda i: (0, i))       # H^T column tiles
    h_spec = pl.BlockSpec((tn, Ep), lambda i: (i, 0))        # H row tiles
    x_spec = pl.BlockSpec((tn, Fip), lambda i: (i, 0))
    dvs_spec = pl.BlockSpec((tn, 1), lambda i: (i, 0))
    dei_spec = pl.BlockSpec((Ep, 1), lambda i: (0, 0))

    def const_spec(shape):
        return pl.BlockSpec(shape, lambda i: (0, 0))         # resident in VMEM

    # ---- Layer 1, phase A: T1 (Ep, Hdp) ----
    t1 = pl.pallas_call(
        _phase_a_kernel,
        out_shape=jax.ShapeDtypeStruct((Ep, Hdp), f32),
        grid=(nt,),
        in_specs=[ht_spec, x_spec, dvs_spec, const_spec((Fip, Hdp)), dei_spec],
        out_specs=pl.BlockSpec((Ep, Hdp), lambda i: (0, 0)),
        compiler_params=pltpu.CompilerParams(
            dimension_semantics=("arbitrary",),
            vmem_limit_bytes=vmem_limit),
    )(HTb, Xp, dvs, W1p, dei)

    # ---- Layer 1 phase B fused with layer 2 phase A: T2 (Ep, Odp) ----
    t2 = pl.pallas_call(
        _phase_m_kernel,
        out_shape=jax.ShapeDtypeStruct((Ep, Odp), f32),
        grid=(nt,),
        in_specs=[h_spec, ht_spec, dvs_spec, const_spec((Ep, Hdp)),
                  const_spec((1, Hdp)), const_spec((Hdp, Odp)), dei_spec],
        out_specs=pl.BlockSpec((Ep, Odp), lambda i: (0, 0)),
        compiler_params=pltpu.CompilerParams(
            dimension_semantics=("arbitrary",),
            vmem_limit_bytes=vmem_limit),
    )(Hb, HTb, dvs, t1, b1p, W2p, dei)

    # ---- Layer 2, phase B: final output tiles (row-parallel for v7x) ----
    out_p = pl.pallas_call(
        _phase_b_kernel,
        out_shape=jax.ShapeDtypeStruct((Np, Odp), f32),
        grid=(nt,),
        in_specs=[h_spec, dvs_spec, const_spec((Ep, Odp)), const_spec((1, Odp))],
        out_specs=pl.BlockSpec((tn, Odp), lambda i: (i, 0)),
        compiler_params=pltpu.CompilerParams(
            dimension_semantics=("parallel",),
            vmem_limit_bytes=vmem_limit),
    )(Hb, dvs, t2, b2p)

    return out_p[:N, :out_dim]


def reference(X, H, W1, b1, W2, b2):
    dv = H.sum(1)
    de = H.sum(0)
    dvs = 1.0 / jnp.sqrt(dv + 1e-5)
    dei = 1.0 / (de + 1e-5)

    def hg(Xi, W, b):
        XW = Xi @ W
        y = dvs[:, None] * (H @ (dei[:, None] * (H.T @ (dvs[:, None] * XW))))
        return y + b

    h1 = jnp.maximum(hg(X, W1, b1), 0.0)
    return jnp.maximum(hg(h1, W2, b2), 0.0)


if __name__ == "__main__":
    N, E = 16, 8              # nodes, hyperedges
    in_dim, hid_dim, out_dim = 32, 64, 32

    key = jax.random.PRNGKey(0)
    kx, kh, kw1, kw2 = jax.random.split(key, 4)

    # node features
    X = jax.random.normal(kx, (N, in_dim), dtype=jnp.float32)
    # random binary incidence matrix
    H = (jax.random.uniform(kh, (N, E)) < 0.4).astype(jnp.float32)

    # parameters: xavier_uniform_ weights, zero biases (matches reset_parameters)
    bnd1 = (6.0 / (in_dim + hid_dim)) ** 0.5
    W1 = jax.random.uniform(kw1, (in_dim, hid_dim), minval=-bnd1, maxval=bnd1,
                            dtype=jnp.float32)
    b1 = jnp.zeros((hid_dim,), dtype=jnp.float32)
    bnd2 = (6.0 / (hid_dim + out_dim)) ** 0.5
    W2 = jax.random.uniform(kw2, (hid_dim, out_dim), minval=-bnd2, maxval=bnd2,
                            dtype=jnp.float32)
    b2 = jnp.zeros((out_dim,), dtype=jnp.float32)

    out = jax.jit(branch_hgcn)(X, H, W1, b1, W2, b2)
    out = jax.block_until_ready(out)

    ref = reference(X, H, W1, b1, W2, b2)
    assert out.shape == (N, out_dim)
    err = float(jnp.max(jnp.abs(out - ref)))
    assert jnp.allclose(out, ref, atol=1e-4, rtol=1e-4), f"max abs diff {err}"

    print("KERNEL_OK")
</pallas_src>

<mosaic_0001>
module attributes {stable_mosaic.version = 11 : i64} {
  func.func @_phase_a_kernel(%arg0: i32, %arg1: memref<128x16xbf16, #tpu.memory_space<vmem>>, %arg2: memref<16x128xf32, #tpu.memory_space<vmem>>, %arg3: memref<16x1xf32, #tpu.memory_space<vmem>>, %arg4: memref<128x128xf32, #tpu.memory_space<vmem>>, %arg5: memref<128x1xf32, #tpu.memory_space<vmem>>, %arg6: memref<128x128xf32, #tpu.memory_space<vmem>>) attributes {dimension_semantics = [#tpu.dimension_semantics<arbitrary>], iteration_bounds = array<i64: 1>, scalar_prefetch = 0 : i64, scratch_operands = 0 : i64, tpu.core_type = #tpu.core_type<tc>, window_params = [{transform_indices = @transform_0, window_bounds = array<i64: 128, 16>}, {transform_indices = @transform_1, window_bounds = array<i64: 16, 128>}, {transform_indices = @transform_2, window_bounds = array<i64: 16, 1>}, {pipeline_mode = #tpu.pipeline_mode<synchronous>, transform_indices = @transform_3, window_bounds = array<i64: 128, 128>}, {pipeline_mode = #tpu.pipeline_mode<synchronous>, transform_indices = @transform_4, window_bounds = array<i64: 128, 1>}, {pipeline_mode = #tpu.pipeline_mode<synchronous>, transform_indices = @transform_5, window_bounds = array<i64: 128, 128>}]} {
    %c0_i32 = arith.constant 0 : i32
    %0 = arith.cmpi eq, %arg0, %c0_i32 : i32
    %1 = arith.extui %0 : i1 to i32
    %c0_i32_0 = arith.constant 0 : i32
    %2 = arith.cmpi ne, %1, %c0_i32_0 : i32
    scf.if %2 {
      %cst_15 = arith.constant 0.000000e+00 : f32
      %18 = vector.broadcast %cst_15 : f32 to vector<128x128xf32>
      %c0_16 = arith.constant 0 : index
      %c0_17 = arith.constant 0 : index
      %19 = vector.load %arg6[%c0_16, %c0_17] : memref<128x128xf32, #tpu.memory_space<vmem>>, vector<128x128xf32>
      tpu.vector_store %arg6[%c0_16, %c0_17], %18 {strides = array<i32>} : memref<128x128xf32, #tpu.memory_space<vmem>>, vector<128x128xf32>,
    } else {
    }
    %c0 = arith.constant 0 : index
    %c0_1 = arith.constant 0 : index
    %3 = vector.load %arg2[%c0, %c0_1] : memref<16x128xf32, #tpu.memory_space<vmem>>, vector<16x128xf32>
    %c0_2 = arith.constant 0 : index
    %c0_3 = arith.constant 0 : index
    %4 = vector.load %arg4[%c0_2, %c0_3] : memref<128x128xf32, #tpu.memory_space<vmem>>, vector<128x128xf32>
    %cst = arith.constant dense<0.000000e+00> : vector<16x128xf32>
    %5 = tpu.matmul %3, %4, %cst {dimension_numbers = #tpu.dot_dimension_numbers<[1], [0], [0], [1], [0, 0, 1, 1], [], []>} : vector<16x128xf32>, vector<128x128xf32>, vector<16x128xf32> -> vector<16x128xf32>
    %c0_4 = arith.constant 0 : index
    %c0_5 = arith.constant 0 : index
    %6 = vector.load %arg3[%c0_4, %c0_5] : memref<16x1xf32, #tpu.memory_space<vmem>>, vector<16x1xf32>
    %7 = vector.broadcast %6 : vector<16x1xf32> to vector<16x128xf32>
    %8 = arith.mulf %7, %5 : vector<16x128xf32>
    %c0_6 = arith.constant 0 : index
    %c0_7 = arith.constant 0 : index
    %9 = vector.load %arg1[%c0_6, %c0_7] : memref<128x16xbf16, #tpu.memory_space<vmem>>, vector<128x16xbf16>
    %10 = arith.extf %9 : vector<128x16xbf16> to vector<128x16xf32>
    %c0_8 = arith.constant 0 : index
    %c0_9 = arith.constant 0 : index
    %11 = vector.load %arg6[%c0_8, %c0_9] : memref<128x128xf32, #tpu.memory_space<vmem>>, vector<128x128xf32>
    %cst_10 = arith.constant dense<0.000000e+00> : vector<128x128xf32>
    %12 = tpu.matmul %10, %8, %cst_10 {dimension_numbers = #tpu.dot_dimension_numbers<[1], [0], [0], [1], [0, 0, 1, 1], [], []>} : vector<128x16xf32>, vector<16x128xf32>, vector<128x128xf32> -> vector<128x128xf32>
    %13 = arith.addf %11, %12 : vector<128x128xf32>
    %c0_11 = arith.constant 0 : index
    %c0_12 = arith.constant 0 : index
    %14 = vector.load %arg6[%c0_11, %c0_12] : memref<128x128xf32, #tpu.memory_space<vmem>>, vector<128x128xf32>
    tpu.vector_store %arg6[%c0_11, %c0_12], %13 {strides = array<i32>} : memref<128x128xf32, #tpu.memory_space<vmem>>, vector<128x128xf32>,
    %c0_i32_13 = arith.constant 0 : i32
    %15 = arith.cmpi eq, %arg0, %c0_i32_13 : i32
    %16 = arith.extui %15 : i1 to i32
    %c0_i32_14 = arith.constant 0 : i32
    %17 = arith.cmpi ne, %16, %c0_i32_14 : i32
    scf.if %17 {
      %c0_15 = arith.constant 0 : index
      %c0_16 = arith.constant 0 : index
      %18 = vector.load %arg6[%c0_15, %c0_16] : memref<128x128xf32, #tpu.memory_space<vmem>>, vector<128x128xf32>
      %c0_17 = arith.constant 0 : index
      %c0_18 = arith.constant 0 : index
      %19 = vector.load %arg5[%c0_17, %c0_18] : memref<128x1xf32, #tpu.memory_space<vmem>>, vector<128x1xf32>
      %20 = vector.broadcast %19 : vector<128x1xf32> to vector<128x128xf32>
      %21 = arith.mulf %18, %20 : vector<128x128xf32>
      %c0_19 = arith.constant 0 : index
      %c0_20 = arith.constant 0 : index
      %22 = vector.load %arg6[%c0_19, %c0_20] : memref<128x128xf32, #tpu.memory_space<vmem>>, vector<128x128xf32>
      tpu.vector_store %arg6[%c0_19, %c0_20], %21 {strides = array<i32>} : memref<128x128xf32, #tpu.memory_space<vmem>>, vector<128x128xf32>,
    } else {
    }
    return
  }
  func.func @transform_0(%arg0: i32) -> (i32, i32) {
    %c0_i32 = arith.constant 0 : i32
    %c0_i32_0 = arith.constant 0 : i32
    return %c0_i32, %arg0 : i32, i32
  }
  func.func @transform_1(%arg0: i32) -> (i32, i32) {
    %c0_i32 = arith.constant 0 : i32
    %c0_i32_0 = arith.constant 0 : i32
    return %arg0, %c0_i32 : i32, i32
  }
  func.func @transform_2(%arg0: i32) -> (i32, i32) {
    %c0_i32 = arith.constant 0 : i32
    %c0_i32_0 = arith.constant 0 : i32
    return %arg0, %c0_i32 : i32, i32
  }
  func.func @transform_3(%arg0: i32) -> (i32, i32) {
    %c0_i32 = arith.constant 0 : i32
    %c0_i32_0 = arith.constant 0 : i32
    %c0_i32_1 = arith.constant 0 : i32
    return %c0_i32, %c0_i32_0 : i32, i32
  }
  func.func @transform_4(%arg0: i32) -> (i32, i32) {
    %c0_i32 = arith.constant 0 : i32
    %c0_i32_0 = arith.constant 0 : i32
    %c0_i32_1 = arith.constant 0 : i32
    return %c0_i32, %c0_i32_0 : i32, i32
  }
  func.func @transform_5(%arg0: i32) -> (i32, i32) {
    %c0_i32 = arith.constant 0 : i32
    %c0_i32_0 = arith.constant 0 : i32
    %c0_i32_1 = arith.constant 0 : i32
    return %c0_i32, %c0_i32_0 : i32, i32
  }
}

module attributes {stable_mosaic.version = 11 : i64} {
  func.func @_phase_m_kernel(%arg0: i32, %arg1: memref<16x128xbf16, #tpu.memory_space<vmem>>, %arg2: memref<128x16xbf16, #tpu.memory_space<vmem>>, %arg3: memref<16x1xf32, #tpu.memory_space<vmem>>, %arg4: memref<128x128xf32, #tpu.memory_space<vmem>>, %arg5: memref<1x128xf32, #tpu.memory_space<vmem>>, %arg6: memref<128x128xf32, #tpu.memory_space<vmem>>, %arg7: memref<128x1xf32, #tpu.memory_space<vmem>>, %arg8: memref<128x128xf32, #tpu.memory_space<vmem>>) attributes {dimension_semantics = [#tpu.dimension_semantics<arbitrary>], iteration_bounds = array<i64: 1>, scalar_prefetch = 0 : i64, scratch_operands = 0 : i64, tpu.core_type = #tpu.core_type<tc>, window_params = [{transform_indices = @transform_0, window_bounds = array<i64: 16, 128>}, {transform_indices = @transform_1, window_bounds = array<i64: 128, 16>}, {transform_indices = @transform_2, window_bounds = array<i64: 16, 1>}, {pipeline_mode = #tpu.pipeline_mode<synchronous>, transform_indices = @transform_3, window_bounds = array<i64: 128, 128>}, {pipeline_mode = #tpu.pipeline_mode<synchronous>, transform_indices = @transform_4, window_bounds = array<i64: 1, 128>}, {pipeline_mode = #tpu.pipeline_mode<synchronous>, transform_indices = @transform_5, window_bounds = array<i64: 128, 128>}, {pipeline_mode = #tpu.pipeline_mode<synchronous>, transform_indices = @transform_6, window_bounds = array<i64: 128, 1>}, {pipeline_mode = #tpu.pipeline_mode<synchronous>, transform_indices = @transform_7, window_bounds = array<i64: 128, 128>}]} {
    %c0_i32 = arith.constant 0 : i32
    %0 = arith.cmpi eq, %arg0, %c0_i32 : i32
    %1 = arith.extui %0 : i1 to i32
    %c0_i32_0 = arith.constant 0 : i32
    %2 = arith.cmpi ne, %1, %c0_i32_0 : i32
    scf.if %2 {
      %cst_21 = arith.constant 0.000000e+00 : f32
      %28 = vector.broadcast %cst_21 : f32 to vector<128x128xf32>
      %c0_22 = arith.constant 0 : index
      %c0_23 = arith.constant 0 : index
      %29 = vector.load %arg8[%c0_22, %c0_23] : memref<128x128xf32, #tpu.memory_space<vmem>>, vector<128x128xf32>
      tpu.vector_store %arg8[%c0_22, %c0_23], %28 {strides = array<i32>} : memref<128x128xf32, #tpu.memory_space<vmem>>, vector<128x128xf32>,
    } else {
    }
    %c0 = arith.constant 0 : index
    %c0_1 = arith.constant 0 : index
    %3 = vector.load %arg3[%c0, %c0_1] : memref<16x1xf32, #tpu.memory_space<vmem>>, vector<16x1xf32>
    %c0_2 = arith.constant 0 : index
    %c0_3 = arith.constant 0 : index
    %4 = vector.load %arg1[%c0_2, %c0_3] : memref<16x128xbf16, #tpu.memory_space<vmem>>, vector<16x128xbf16>
    %5 = arith.extf %4 : vector<16x128xbf16> to vector<16x128xf32>
    %c0_4 = arith.constant 0 : index
    %c0_5 = arith.constant 0 : index
    %6 = vector.load %arg4[%c0_4, %c0_5] : memref<128x128xf32, #tpu.memory_space<vmem>>, vector<128x128xf32>
    %cst = arith.constant dense<0.000000e+00> : vector<16x128xf32>
    %7 = tpu.matmul %5, %6, %cst {dimension_numbers = #tpu.dot_dimension_numbers<[1], [0], [0], [1], [0, 0, 1, 1], [], []>} : vector<16x128xf32>, vector<128x128xf32>, vector<16x128xf32> -> vector<16x128xf32>
    %8 = vector.broadcast %3 : vector<16x1xf32> to vector<16x128xf32>
    %9 = arith.mulf %8, %7 : vector<16x128xf32>
    %c0_6 = arith.constant 0 : index
    %c0_7 = arith.constant 0 : index
    %10 = vector.load %arg5[%c0_6, %c0_7] : memref<1x128xf32, #tpu.memory_space<vmem>>, vector<1x128xf32>
    %11 = vector.broadcast %10 : vector<1x128xf32> to vector<16x128xf32>
    %12 = arith.addf %9, %11 : vector<16x128xf32>
    %cst_8 = arith.constant 0.000000e+00 : f32
    %13 = vector.broadcast %cst_8 : f32 to vector<16x128xf32>
    %14 = arith.maximumf %12, %13 : vector<16x128xf32>
    %c0_9 = arith.constant 0 : index
    %c0_10 = arith.constant 0 : index
    %15 = vector.load %arg6[%c0_9, %c0_10] : memref<128x128xf32, #tpu.memory_space<vmem>>, vector<128x128xf32>
    %cst_11 = arith.constant dense<0.000000e+00> : vector<16x128xf32>
    %16 = tpu.matmul %14, %15, %cst_11 {dimension_numbers = #tpu.dot_dimension_numbers<[1], [0], [0], [1], [0, 0, 1, 1], [], []>} : vector<16x128xf32>, vector<128x128xf32>, vector<16x128xf32> -> vector<16x128xf32>
    %17 = vector.broadcast %3 : vector<16x1xf32> to vector<16x128xf32>
    %18 = arith.mulf %17, %16 : vector<16x128xf32>
    %c0_12 = arith.constant 0 : index
    %c0_13 = arith.constant 0 : index
    %19 = vector.load %arg2[%c0_12, %c0_13] : memref<128x16xbf16, #tpu.memory_space<vmem>>, vector<128x16xbf16>
    %20 = arith.extf %19 : vector<128x16xbf16> to vector<128x16xf32>
    %c0_14 = arith.constant 0 : index
    %c0_15 = arith.constant 0 : index
    %21 = vector.load %arg8[%c0_14, %c0_15] : memref<128x128xf32, #tpu.memory_space<vmem>>, vector<128x128xf32>
    %cst_16 = arith.constant dense<0.000000e+00> : vector<128x128xf32>
    %22 = tpu.matmul %20, %18, %cst_16 {dimension_numbers = #tpu.dot_dimension_numbers<[1], [0], [0], [1], [0, 0, 1, 1], [], []>} : vector<128x16xf32>, vector<16x128xf32>, vector<128x128xf32> -> vector<128x128xf32>
    %23 = arith.addf %21, %22 : vector<128x128xf32>
    %c0_17 = arith.constant 0 : index
    %c0_18 = arith.constant 0 : index
    %24 = vector.load %arg8[%c0_17, %c0_18] : memref<128x128xf32, #tpu.memory_space<vmem>>, vector<128x128xf32>
    tpu.vector_store %arg8[%c0_17, %c0_18], %23 {strides = array<i32>} : memref<128x128xf32, #tpu.memory_space<vmem>>, vector<128x128xf32>,
    %c0_i32_19 = arith.constant 0 : i32
    %25 = arith.cmpi eq, %arg0, %c0_i32_19 : i32
    %26 = arith.extui %25 : i1 to i32
    %c0_i32_20 = arith.constant 0 : i32
    %27 = arith.cmpi ne, %26, %c0_i32_20 : i32
    scf.if %27 {
      %c0_21 = arith.constant 0 : index
      %c0_22 = arith.constant 0 : index
      %28 = vector.load %arg8[%c0_21, %c0_22] : memref<128x128xf32, #tpu.memory_space<vmem>>, vector<128x128xf32>
      %c0_23 = arith.constant 0 : index
      %c0_24 = arith.constant 0 : index
      %29 = vector.load %arg7[%c0_23, %c0_24] : memref<128x1xf32, #tpu.memory_space<vmem>>, vector<128x1xf32>
      %30 = vector.broadcast %29 : vector<128x1xf32> to vector<128x128xf32>
      %31 = arith.mulf %28, %30 : vector<128x128xf32>
      %c0_25 = arith.constant 0 : index
      %c0_26 = arith.constant 0 : index
      %32 = vector.load %arg8[%c0_25, %c0_26] : memref<128x128xf32, #tpu.memory_space<vmem>>, vector<128x128xf32>
      tpu.vector_store %arg8[%c0_25, %c0_26], %31 {strides = array<i32>} : memref<128x128xf32, #tpu.memory_space<vmem>>, vector<128x128xf32>,
    } else {
    }
    return
  }
  func.func @transform_0(%arg0: i32) -> (i32, i32) {
    %c0_i32 = arith.constant 0 : i32
    %c0_i32_0 = arith.constant 0 : i32
    return %arg0, %c0_i32 : i32, i32
  }
  func.func @transform_1(%arg0: i32) -> (i32, i32) {
    %c0_i32 = arith.constant 0 : i32
    %c0_i32_0 = arith.constant 0 : i32
    return %c0_i32, %arg0 : i32, i32
  }
  func.func @transform_2(%arg0: i32) -> (i32, i32) {
    %c0_i32 = arith.constant 0 : i32
    %c0_i32_0 = arith.constant 0 : i32
    return %arg0, %c0_i32 : i32, i32
  }
  func.func @transform_3(%arg0: i32) -> (i32, i32) {
    %c0_i32 = arith.constant 0 : i32
    %c0_i32_0 = arith.constant 0 : i32
    %c0_i32_1 = arith.constant 0 : i32
    return %c0_i32, %c0_i32_0 : i32, i32
  }
  func.func @transform_4(%arg0: i32) -> (i32, i32) {
    %c0_i32 = arith.constant 0 : i32
    %c0_i32_0 = arith.constant 0 : i32
    %c0_i32_1 = arith.constant 0 : i32
    return %c0_i32, %c0_i32_0 : i32, i32
  }
  func.func @transform_5(%arg0: i32) -> (i32, i32) {
    %c0_i32 = arith.constant 0 : i32
    %c0_i32_0 = arith.constant 0 : i32
    %c0_i32_1 = arith.constant 0 : i32
    return %c0_i32, %c0_i32_0 : i32, i32
  }
  func.func @transform_6(%arg0: i32) -> (i32, i32) {
    %c0_i32 = arith.constant 0 : i32
    %c0_i32_0 = arith.constant 0 : i32
    %c0_i32_1 = arith.constant 0 : i32
    return %c0_i32, %c0_i32_0 : i32, i32
  }
  func.func @transform_7(%arg0: i32) -> (i32, i32) {
    %c0_i32 = arith.constant 0 : i32
    %c0_i32_0 = arith.constant 0 : i32
    %c0_i32_1 = arith.constant 0 : i32
    return %c0_i32, %c0_i32_0 : i32, i32
  }
}

module attributes {stable_mosaic.version = 11 : i64} {
  func.func @_phase_b_kernel(%arg0: i32, %arg1: memref<16x128xbf16, #tpu.memory_space<vmem>>, %arg2: memref<16x1xf32, #tpu.memory_space<vmem>>, %arg3: memref<128x128xf32, #tpu.memory_space<vmem>>, %arg4: memref<1x128xf32, #tpu.memory_space<vmem>>, %arg5: memref<16x128xf32, #tpu.memory_space<vmem>>) attributes {dimension_semantics = [#tpu.dimension_semantics<parallel>], iteration_bounds = array<i64: 1>, scalar_prefetch = 0 : i64, scratch_operands = 0 : i64, tpu.core_type = #tpu.core_type<tc>, window_params = [{transform_indices = @transform_0, window_bounds = array<i64: 16, 128>}, {transform_indices = @transform_1, window_bounds = array<i64: 16, 1>}, {pipeline_mode = #tpu.pipeline_mode<synchronous>, transform_indices = @transform_2, window_bounds = array<i64: 128, 128>}, {pipeline_mode = #tpu.pipeline_mode<synchronous>, transform_indices = @transform_3, window_bounds = array<i64: 1, 128>}, {transform_indices = @transform_4, window_bounds = array<i64: 16, 128>}]} {
    %c0 = arith.constant 0 : index
    %c0_0 = arith.constant 0 : index
    %0 = vector.load %arg1[%c0, %c0_0] : memref<16x128xbf16, #tpu.memory_space<vmem>>, vector<16x128xbf16>
    %1 = arith.extf %0 : vector<16x128xbf16> to vector<16x128xf32>
    %c0_1 = arith.constant 0 : index
    %c0_2 = arith.constant 0 : index
    %2 = vector.load %arg3[%c0_1, %c0_2] : memref<128x128xf32, #tpu.memory_space<vmem>>, vector<128x128xf32>
    %cst = arith.constant dense<0.000000e+00> : vector<16x128xf32>
    %3 = tpu.matmul %1, %2, %cst {dimension_numbers = #tpu.dot_dimension_numbers<[1], [0], [0], [1], [0, 0, 1, 1], [], []>} : vector<16x128xf32>, vector<128x128xf32>, vector<16x128xf32> -> vector<16x128xf32>
    %c0_3 = arith.constant 0 : index
    %c0_4 = arith.constant 0 : index
    %4 = vector.load %arg2[%c0_3, %c0_4] : memref<16x1xf32, #tpu.memory_space<vmem>>, vector<16x1xf32>
    %5 = vector.broadcast %4 : vector<16x1xf32> to vector<16x128xf32>
    %6 = arith.mulf %5, %3 : vector<16x128xf32>
    %c0_5 = arith.constant 0 : index
    %c0_6 = arith.constant 0 : index
    %7 = vector.load %arg4[%c0_5, %c0_6] : memref<1x128xf32, #tpu.memory_space<vmem>>, vector<1x128xf32>
    %8 = vector.broadcast %7 : vector<1x128xf32> to vector<16x128xf32>
    %9 = arith.addf %6, %8 : vector<16x128xf32>
    %cst_7 = arith.constant 0.000000e+00 : f32
    %10 = vector.broadcast %cst_7 : f32 to vector<16x128xf32>
    %11 = arith.maximumf %9, %10 : vector<16x128xf32>
    %c0_8 = arith.constant 0 : index
    %c0_9 = arith.constant 0 : index
    %12 = vector.load %arg5[%c0_8, %c0_9] : memref<16x128xf32, #tpu.memory_space<vmem>>, vector<16x128xf32>
    tpu.vector_store %arg5[%c0_8, %c0_9], %11 {strides = array<i32>} : memref<16x128xf32, #tpu.memory_space<vmem>>, vector<16x128xf32>,
    return
  }
  func.func @transform_0(%arg0: i32) -> (i32, i32) {
    %c0_i32 = arith.constant 0 : i32
    %c0_i32_0 = arith.constant 0 : i32
    return %arg0, %c0_i32 : i32, i32
  }
  func.func @transform_1(%arg0: i32) -> (i32, i32) {
    %c0_i32 = arith.constant 0 : i32
    %c0_i32_0 = arith.constant 0 : i32
    return %arg0, %c0_i32 : i32, i32
  }
  func.func @transform_2(%arg0: i32) -> (i32, i32) {
    %c0_i32 = arith.constant 0 : i32
    %c0_i32_0 = arith.constant 0 : i32
    %c0_i32_1 = arith.constant 0 : i32
    return %c0_i32, %c0_i32_0 : i32, i32
  }
  func.func @transform_3(%arg0: i32) -> (i32, i32) {
    %c0_i32 = arith.constant 0 : i32
    %c0_i32_0 = arith.constant 0 : i32
    %c0_i32_1 = arith.constant 0 : i32
    return %c0_i32, %c0_i32_0 : i32, i32
  }
  func.func @transform_4(%arg0: i32) -> (i32, i32) {
    %c0_i32 = arith.constant 0 : i32
    %c0_i32_0 = arith.constant 0 : i32
    return %arg0, %c0_i32 : i32, i32
  }
}

</mosaic_0001>

<bundles_post_ra>
// kernel: branch_hgcn.5
= control target key start
LH: loop header
LB: loop body
LE: loop exit
PB: predicated region body
PF: predicated region fallthrough
CT: control target
= control target key end

     0   :  { %v275_v5 = vmov 0   ;;  %s376_s0 = inlined_call_operand.vmem [shape: bf16[16,128], index: 0, kind: input, shape index: {}]   ;;  %s377_s1 = inlined_call_operand.vmem [shape: f32[16,1], index: 1, kind: input, shape index: {}]   ;;  %s378_s2 = inlined_call_operand.vmem [shape: f32[128,128], index: 2, kind: input, shape index: {}]   ;;  %s379_s3 = inlined_call_operand.vmem [shape: f32[1,128], index: 3, kind: input, shape index: {}]   ;;  %s380_s4 = inlined_call_operand.hbm [shape: f32[16,128], index: 4, kind: output, shape index: {}]  }
   0x1   :  { %v22_v0 = vld [vmem:[%s378_s2] sm:$0xff]  ;;  %v23_v1 = vld [vmem:[%s378_s2 + $0x8] sm:$0xff]  ;;  %v24_v2 = vld [vmem:[%s378_s2 + $0x10] sm:$0xff]  ;;  %250 = vset.pattern.permute.xlu0 %v275_v5 }
   0x2   :  { %v214_v3 = vpack.c.bf16 %v23_v1, %v22_v0  ;;  %v25_v4 = vld [vmem:[%s378_s2 + $0x18] sm:$0xff]  ;;  %v26_v7 = vld [vmem:[%s378_s2 + $0x20] sm:$0xff]  ;;  %v27_v8 = vld [vmem:[%s378_s2 + $0x28] sm:$0xff] }
   0x3   :  { %v218_v6 = vpack.c.bf16 %v25_v4, %v24_v2  ;;  %v222_v9 = vpack.c.bf16 %v27_v8, %v26_v7  ;;  %v158_v10 = vld [vmem:[%s376_s0] sm:$0xff]   ;;  %v28_v12 = vld [vmem:[%s378_s2 + $0x30] sm:$0xff]  ;;  %v29_v13 = vld [vmem:[%s378_s2 + $0x38] sm:$0xff] }
   0x4   :  { %215 = vmatprep.subr.bf16.mxu0 %v214_v3  ;;  %v113_v11 = vld [vmem:[%s377_s1] sm:$0xff]  ;;  %v159_v14 = vunpack.c.l.bf16 %v158_v10 }
   0x5   :  { %217 = vmatpush3.bf16.msra.mxu0 %v214_v3  ;;  %117 = vperm.xlu0 %250, %v113_v11  }
   0x6   :  { %219 = vmatprep.subr.bf16.mxu0 %v218_v6 }
   0x7   :  { %9 = vsyncpa [#allocation3], 0  ;;  %v114_v15 = vld [vmem:[%s377_s1 + $0x8] sm:$0xff]  ;;  %211 = vmatprep.mubr.f32.mxu0 %v159_v14  ;;  %v226_v16 = vpack.c.bf16 %v29_v13, %v28_v12  ;;  %v30_v17 = vld [vmem:[%s378_s2 + $0x40] sm:$0xff]  ;;  %v160_v29 = vunpack.c.h.bf16 %v158_v10  ;;  %s276_s27 = smov [#allocation2]  }
   0x8   :  { %v31_v18 = vld [vmem:[%s378_s2 + $0x48] sm:$0xff]  ;;  %v32_v20 = vld [vmem:[%s378_s2 + $0x50] sm:$0xff]  ;;  %v33_v21 = vld [vmem:[%s378_s2 + $0x58] sm:$0xff] }
   0x9   :  { %221 = vmatpush3.bf16.msra.mxu0 %v218_v6  ;;  %122 = vperm.xlu0 %250, %v114_v15   ;;  %v230_v19 = vpack.c.bf16 %v31_v18, %v30_v17  ;;  %v234_v22 = vpack.c.bf16 %v33_v21, %v32_v20  ;;  %v34_v23 = vld [vmem:[%s378_s2 + $0x60] sm:$0xff]  ;;  %v35_v24 = vld [vmem:[%s378_s2 + $0x68] sm:$0xff]  ;;  %v36_v26 = vld [vmem:[%s378_s2 + $0x70] sm:$0xff] }
   0xa   :  { %223 = vmatprep.subr.bf16.mxu0 %v222_v9  ;;  %v238_v25 = vpack.c.bf16 %v35_v24, %v34_v23  ;;  %v37_v27 = vld [vmem:[%s378_s2 + $0x78] sm:$0xff]  ;;  %v156_v33 = vld [vmem:[%s379_s3] ss:$0 sm:$0xff]  ;;  %s145_s2 = sshll.u32 %s276_s27, 4  ;;  %s146_s2 = int_to_ptr.vmem [resolvable:$true] %s145_s2 }
   0xb   :  { %v242_v28 = vpack.c.bf16 %v37_v27, %v36_v26  ;;  %s251_s28 = scalar_lea.vmem %s146_s2, 256  ;;  %p256_p1 = scmp.lt.s32.totalorder %s146_s2, %s146_s2 }
   0xc   :  { %p252_p0 = scmp.ne.s32.totalorder %s146_s2, %s251_s28  ;;  %p257_p2 = scmp.lt.s32.totalorder %s251_s28, %s251_s28 }
   0xd   :  { %225 = vmatpush3.bf16.msra.mxu0 %v222_v9 }
   0xe   :  { %227 = vmatprep.subr.bf16.mxu0 %v226_v16  ;;  %p258_p3 = por %p257_p2, %p256_p1 }
  0x10   :  { %p259_p4 = pnand %p258_p3, %p252_p0 }
  0x11   :  { %229 = vmatpush3.bf16.msra.mxu0 %v226_v16 }
  0x12   :  { %231 = vmatprep.subr.bf16.mxu0 %v230_v19 }
  0x15   :  { %233 = vmatpush3.bf16.msra.mxu0 %v230_v19 }
  0x16   :  { %235 = vmatprep.subr.bf16.mxu0 %v234_v22 }
  0x19   :  { %237 = vmatpush3.bf16.msra.mxu0 %v234_v22 }
  0x1a   :  { %239 = vmatprep.subr.bf16.mxu0 %v238_v25 }
  0x1d   :  { %241 = vmatpush3.bf16.msra.mxu0 %v238_v25 }
  0x1e   :  { %243 = vmatprep.subr.bf16.mxu0 %v242_v28 }
  0x21   :  { %245 = vmatpush3.bf16.msra.mxu0 %v242_v28 }
  0x24   :  { %212 = vmatmul.mubr.f32.vlgmr.msra.gmra.mrb[0].mxu0 %v160_v29 }
  0x84   :  { %v118_v30 = vpop.permute.xlu0 %117 }
  0x88   :  { %v123_v31 = vpop.permute.xlu0 %122 }
  0xf7   :  { %v213_v32 = vpop.f32.mrb[0].mxu0 }
  0xf8   :  { %v126_v34 = vmul.f32 %v213_v32, %v123_v31  ;;  %v104_v35 = vpop.f32.mrb[1].mxu0 }
  0xf9   :  { %v125_v36 = vmul.f32 %v118_v30, %v104_v35 }
  0xfa   :  { %v135_v37 = vadd.f32 %v156_v33, %v126_v34 }
  0xfb   :  { %v134_v38 = vadd.f32 %v156_v33, %v125_v36 }
  0xfc   :  { %v137_v39 = vmax.f32 %v135_v37, 0.0 }
  0xfd   :  { %v136_v40 = vmax.f32 %v134_v38, 0.0 }
  0xfe   :  { %139 = vst [vmem:[#allocation2 + $0x8] sm:$0xff] %v137_v39 }
  0xff   :  { %138 = vst [vmem:[#allocation2] sm:$0xff] %v136_v40 }
 0x100   :  { %262 = shalt.err (!%p259_p4)
}
 0x101   :  { %s263_s30 = scalar_lea.hbm %s380_s4, 256 }
 0x102   :  { %p264_p5 = scmp.ne.s32.totalorder %s380_s4, %s263_s30  ;;  %p267_p6 = scmp.lt.u32.totalorder %s263_s30, %s380_s4 }
 0x104   :  { %p269_p7 = pnand %p267_p6, %p264_p5 }
 0x106   :  { %272 = shalt.err (!%p269_p7)
}
 0x107   :  { %s277_s9 = smov 128   ;;  %s278_s10 = smov 8  }
 0x108   :  { %151 = dma.vmem_to_hbm [thread:$0]  %s146_s2, 256, %s380_s4, [#allocation3], %s277_s9, %s277_s9, %s278_s10  }
 0x109   :  { %273 = dma.done.wait [#allocation3], 256  }
 0x10a   :  { %274 = vsyncadd [#allocation3], 4294967040 }
 0x10b   :  { %155 = vsyncpa [#allocation3], 1 }

// kernel: branch_hgcn.3
= control target key start
LH: loop header
LB: loop body
LE: loop exit
PB: predicated region body
PF: predicated region fallthrough
CT: control target
= control target key end

     0   :  { %v766_v3 = vmov 0   ;;  %vm195_vm0 = vcmask 130048   ;;  %s993_s3 = inlined_call_operand.vmem [shape: f32[128,128], index: 3, kind: input, shape index: {}]   ;;  %s994_s1 = inlined_call_operand.vmem [shape: f32[16,128], index: 1, kind: input, shape index: {}]   ;;  %s995_s2 = inlined_call_operand.vmem [shape: f32[16,1], index: 2, kind: input, shape index: {}]   ;;  %s996_s4 = inlined_call_operand.vmem [shape: f32[128,1], index: 4, kind: input, shape index: {}]   ;;  %s997_s0 = inlined_call_operand.vmem [shape: bf16[128,16], index: 0, kind: input, shape index: {}]   ;;  %s998_s5 = inlined_call_operand.vmem [shape: f32[128,128], index: 5, kind: output, shape index: {}]  }
   0x1   :  { %v42_v0 = vld [vmem:[%s993_s3] sm:$0xff]  ;;  %v43_v1 = vld [vmem:[%s993_s3 + $0x8] sm:$0xff]  ;;  %v44_v2 = vld [vmem:[%s993_s3 + $0x10] sm:$0xff]  ;;  %764 = vset.pattern.permute.xlu0 %v766_v3  ;;  %765 = vset.pattern.permute.xlu1 %v766_v3 }
   0x2   :  { %v726_v4 = vpack.c.bf16 %v43_v1, %v42_v0  ;;  %v45_v5 = vld [vmem:[%s993_s3 + $0x18] sm:$0xff]  ;;  %v46_v7 = vld [vmem:[%s993_s3 + $0x20] sm:$0xff]  ;;  %v47_v8 = vld [vmem:[%s993_s3 + $0x28] sm:$0xff] }
   0x3   :  { %v730_v6 = vpack.c.bf16 %v45_v5, %v44_v2  ;;  %v734_v9 = vpack.c.bf16 %v47_v8, %v46_v7  ;;  %v40_v10 = vld [vmem:[%s994_s1] sm:$0xff]  ;;  %v48_v11 = vld [vmem:[%s993_s3 + $0x30] sm:$0xff]  ;;  %v49_v12 = vld [vmem:[%s993_s3 + $0x38] sm:$0xff] }
   0x4   :  { %727 = vmatprep.subr.bf16.mxu0 %v726_v4  ;;  %695 = vmatprep.mubr.f32.mxu0 %v40_v10  ;;  %v133_v13 = vld [vmem:[%s995_s2] sm:$0xff]  ;;  %v134_v14 = vld [vmem:[%s995_s2 + $0x8] sm:$0xff]  ;;  %v738_v15 = vpack.c.bf16 %v49_v12, %v48_v11  ;;  %v442_v18 = vld [vmem:[%s996_s4 + $0x10] sm:$0xff] }
   0x5   :  { %729 = vmatpush3.bf16.msra.mxu0 %v726_v4  ;;  %137 = vperm.xlu0 %764, %v133_v13   ;;  %v50_v16 = vld [vmem:[%s993_s3 + $0x40] sm:$0xff]  ;;  %v51_v17 = vld [vmem:[%s993_s3 + $0x48] sm:$0xff]  ;;  %v52_v20 = vld [vmem:[%s993_s3 + $0x50] sm:$0xff] }
   0x6   :  { %731 = vmatprep.subr.bf16.mxu0 %v730_v6  ;;  %v742_v19 = vpack.c.bf16 %v51_v17, %v50_v16  ;;  %v53_v21 = vld [vmem:[%s993_s3 + $0x58] sm:$0xff]  ;;  %v444_v22 = vld [vmem:[%s996_s4 + $0x20] sm:$0xff]  ;;  %v55_v25 = vld [vmem:[%s993_s3 + $0x68] sm:$0xff] }
   0x7   :  { %v746_v23 = vpack.c.bf16 %v53_v21, %v52_v20  ;;  %v54_v24 = vld [vmem:[%s993_s3 + $0x60] sm:$0xff]  ;;  %v446_v26 = vld [vmem:[%s996_s4 + $0x30] sm:$0xff]  ;;  %v57_v29 = vld [vmem:[%s993_s3 + $0x78] sm:$0xff] }
   0x8   :  { %v750_v27 = vpack.c.bf16 %v55_v25, %v54_v24  ;;  %v56_v28 = vld [vmem:[%s993_s3 + $0x70] sm:$0xff]  ;;  %v448_v30 = vld [vmem:[%s996_s4 + $0x40] sm:$0xff]  ;;  %v41_v33 = vld [vmem:[%s994_s1 + $0x8] sm:$0xff] }
   0x9   :  { %733 = vmatpush3.bf16.msra.mxu0 %v730_v6  ;;  %142 = vperm.xlu0 %764, %v134_v14   ;;  %v754_v31 = vpack.c.bf16 %v57_v29, %v56_v28  ;;  %v450_v32 = vld [vmem:[%s996_s4 + $0x50] sm:$0xff]  ;;  %v452_v34 = vld [vmem:[%s996_s4 + $0x60] sm:$0xff]  ;;  %v441_v39 = vld [vmem:[%s996_s4 + $0x8] sm:$0xff] }
   0xa   :  { %735 = vmatprep.subr.bf16.mxu0 %v734_v9  ;;  %v454_v35 = vld [vmem:[%s996_s4 + $0x70] sm:$0xff]  ;;  %v589_v36 = vld [vmem:[%s997_s0] sm:$0xff]   ;;  %v443_v40 = vld [vmem:[%s996_s4 + $0x18] sm:$0xff] }
   0xb   :  { %v590_v37 = vunpack.c.l.bf16 %v589_v36  ;;  %v440_v38 = vld [vmem:[%s996_s4] sm:$0xff]  ;;  %v445_v41 = vld [vmem:[%s996_s4 + $0x28] sm:$0xff]  ;;  %v447_v42 = vld [vmem:[%s996_s4 + $0x38] sm:$0xff]  ;;  %v591_v55 = vunpack.c.h.bf16 %v589_v36 }
   0xc   :  { %458 = vperm.xlu1 %765, %v440_v38   ;;  %v449_v43 = vld [vmem:[%s996_s4 + $0x48] sm:$0xff]  ;;  %v451_v44 = vld [vmem:[%s996_s4 + $0x58] sm:$0xff]  ;;  %v621_v57 = vld [vmem:[%s997_s0 + $0x10] sm:$0xff]  }
   0xd   :  { %737 = vmatpush3.bf16.msra.mxu0 %v734_v9  ;;  %468 = vperm.xlu0 %764, %v442_v18   ;;  %v453_v45 = vld [vmem:[%s996_s4 + $0x68] sm:$0xff]  ;;  %v455_v46 = vld [vmem:[%s996_s4 + $0x78] sm:$0xff]  ;;  %v598_v59 = vunpack.c.l.bf16 %v621_v57  ;;  %v599_v61 = vunpack.c.h.bf16 %v621_v57  ;;  %v623_v63 = vld [vmem:[%s997_s0 + $0x20] sm:$0xff]  }
   0xe   :  { %739 = vmatprep.subr.bf16.mxu0 %v738_v15  ;;  %702 = vmatprep.mubr.msk.f32.mxu1 %vm195_vm0, %v590_v37  ;;  %v620_v54 = vld [vmem:[%s997_s0 + $0x8] sm:$0xff]   ;;  %v622_v60 = vld [vmem:[%s997_s0 + $0x18] sm:$0xff]   ;;  %v606_v1 = vunpack.c.l.bf16 %v623_v63  ;;  %v607_v3 = vunpack.c.h.bf16 %v623_v63  ;;  %v625_v5 = vld [vmem:[%s997_s0 + $0x30] sm:$0xff]  }
   0xf   :  { %v594_v56 = vunpack.c.l.bf16 %v620_v54  ;;  %v595_v58 = vunpack.c.h.bf16 %v620_v54  ;;  %v602_v62 = vunpack.c.l.bf16 %v622_v60  ;;  %v603_v0 = vunpack.c.h.bf16 %v622_v60  ;;  %v624_v2 = vld [vmem:[%s997_s0 + $0x28] sm:$0xff]   ;;  %v626_v8 = vld [vmem:[%s997_s0 + $0x38] sm:$0xff]  }
  0x10   :  { %463 = vperm.xlu1 %765, %v441_v39   ;;  %v610_v4 = vunpack.c.l.bf16 %v624_v2  ;;  %v611_v6 = vunpack.c.h.bf16 %v624_v2  ;;  %v614_v7 = vunpack.c.l.bf16 %v625_v5  ;;  %v615_v9 = vunpack.c.h.bf16 %v625_v5 }
  0x11   :  { %741 = vmatpush3.bf16.msra.mxu0 %v738_v15  ;;  %478 = vperm.xlu0 %764, %v444_v22   ;;  %v618_v10 = vunpack.c.l.bf16 %v626_v8  ;;  %v619_v11 = vunpack.c.h.bf16 %v626_v8 }
  0x12   :  { %743 = vmatprep.subr.bf16.mxu0 %v742_v19 }
  0x14   :  { %473 = vperm.xlu1 %765, %v443_v40  }
  0x15   :  { %745 = vmatpush3.bf16.msra.mxu0 %v742_v19  ;;  %488 = vperm.xlu0 %764, %v446_v26  }
  0x16   :  { %747 = vmatprep.subr.bf16.mxu0 %v746_v23 }
  0x18   :  { %483 = vperm.xlu1 %765, %v445_v41  }
  0x19   :  { %749 = vmatpush3.bf16.msra.mxu0 %v746_v23  ;;  %498 = vperm.xlu0 %764, %v448_v30  }
  0x1a   :  { %751 = vmatprep.subr.bf16.mxu0 %v750_v27 }
  0x1c   :  { %493 = vperm.xlu1 %765, %v447_v42  }
  0x1d   :  { %753 = vmatpush3.bf16.msra.mxu0 %v750_v27  ;;  %508 = vperm.xlu0 %764, %v450_v32  }
  0x1e   :  { %755 = vmatprep.subr.bf16.mxu0 %v754_v31 }
  0x20   :  { %503 = vperm.xlu1 %765, %v449_v43  }
  0x21   :  { %757 = vmatpush3.bf16.msra.mxu0 %v754_v31  ;;  %518 = vperm.xlu0 %764, %v452_v34  }
  0x24   :  { %696 = vmatmul.mubr.f32.vlgmr.msra.gmra.mrb[0].mxu0 %v41_v33  ;;  %513 = vperm.xlu1 %765, %v451_v44  }
  0x25   :  { %528 = vperm.xlu0 %764, %v454_v35  }
  0x28   :  { %523 = vperm.xlu1 %765, %v453_v45  }
  0x2c   :  { %533 = vperm.xlu1 %765, %v455_v46  }
  0x84   :  { %v138_v47 = vpop.permute.xlu0 %137 }
  0x88   :  { %v143_v48 = vpop.permute.xlu0 %142 }
  0x8b   :  { %v459_v12 = vpop.permute.xlu1 %458 }
  0x8c   :  { %v469_v15 = vpop.permute.xlu0 %468 }
  0x8f   :  { %v464_v13 = vpop.permute.xlu1 %463 }
  0x90   :  { %v479_v18 = vpop.permute.xlu0 %478 }
  0x93   :  { %v474_v14 = vpop.permute.xlu1 %473 }
  0x94   :  { %v489_v25 = vpop.permute.xlu0 %488 }
  0x97   :  { %v484_v16 = vpop.permute.xlu1 %483 }
  0x98   :  { %v499_v34 = vpop.permute.xlu0 %498 }
  0x9b   :  { %v494_v24 = vpop.permute.xlu1 %493 }
  0x9c   :  { %v509_v41 = vpop.permute.xlu0 %508 }
  0x9f   :  { %v504_v31 = vpop.permute.xlu1 %503 }
  0xa3   :  { %v514_v40 = vpop.permute.xlu1 %513 }
  0xf7   :  { %v697_v49 = vpop.f32.mrb[0].mxu0 }
  0xf8   :  { %v146_v50 = vmul.f32 %v697_v49, %v143_v48  ;;  %v124_v51 = vpop.f32.mrb[1].mxu0 }
  0xf9   :  { %v145_v52 = vmul.f32 %v138_v47, %v124_v51  ;;  %v524_v47 = vpop.permute.xlu1 %523 }
  0xfb   :  { %v758_v53 = vpack.c.bf16 %v146_v50, %v145_v52  ;;  %v519_v50 = vpop.permute.xlu0 %518 }
  0xfd   :  { %759 = vmatprep.subr.bf16.mxu1 %v758_v53 }
  0xfe   :  { %761 = vmatpush3.bf16.msra.mxu1 %v758_v53 }
  0xff   :  { %v529_v57 = vpop.permute.xlu0 %528 }
 0x101   :  { %703 = vmatmul.mubr.msk.f32.vlgmr.msra.gmra.mrb[0].mxu1 %vm195_vm0, %v591_v55 }
 0x102   :  { %705 = vmatprep.mubr.msk.f32.mxu1 %vm195_vm0, %v594_v56  ;;  %v534_v56 = vpop.permute.xlu1 %533 }
 0x105   :  { %706 = vmatmul.mubr.msk.f32.gmra.mrb[2].mxu1 %vm195_vm0, %v595_v58 }
 0x106   :  { %708 = vmatprep.mubr.msk.f32.mxu1 %vm195_vm0, %v598_v59 }
 0x109   :  { %709 = vmatmul.mubr.msk.f32.gmra.mrb[4].mxu1 %vm195_vm0, %v599_v61 }
 0x10a   :  { %711 = vmatprep.mubr.msk.f32.mxu1 %vm195_vm0, %v602_v62 }
 0x10d   :  { %712 = vmatmul.mubr.msk.f32.gmra.mrb[6].mxu1 %vm195_vm0, %v603_v0 }
 0x10e   :  { %714 = vmatprep.mubr.msk.f32.mxu1 %vm195_vm0, %v606_v1 }
 0x111   :  { %715 = vmatmul.mubr.msk.f32.gmra.mrb[8].mxu1 %vm195_vm0, %v607_v3 }
 0x112   :  { %717 = vmatprep.mubr.msk.f32.mxu1 %vm195_vm0, %v610_v4 }
 0x115   :  { %718 = vmatmul.mubr.msk.f32.gmra.mrb[10].mxu1 %vm195_vm0, %v611_v6 }
 0x116   :  { %720 = vmatprep.mubr.msk.f32.mxu1 %vm195_vm0, %v614_v7 }
 0x119   :  { %721 = vmatmul.mubr.msk.f32.gmra.mrb[12].mxu1 %vm195_vm0, %v615_v9 }
 0x11a   :  { %723 = vmatprep.mubr.msk.f32.mxu1 %vm195_vm0, %v618_v10 }
 0x11d   :  { %724 = vmatmul.mubr.msk.f32.gmra.mrb[14].mxu1 %vm195_vm0, %v619_v11 }
 0x1d4   :  { %v704_v17 = vpop.f32.mrb[0].mxu1 }
 0x1d5   :  { %v310_v19 = vpop.f32.mrb[1].mxu1  ;;  %v537_v20 = vmul.f32 %v704_v17, %v464_v13 }
 0x1d6   :  { %v536_v21 = vmul.f32 %v459_v12, %v310_v19 }
 0x1d7   :  { %553 = vst [vmem:[%s998_s5 + $0x8] sm:$0xff] %v537_v20 }
 0x1d8   :  { %v707_v22 = vpop.f32.mrb[2].mxu1  ;;  %552 = vst [vmem:[%s998_s5] sm:$0xff] %v536_v21 }
 0x1d9   :  { %v320_v23 = vpop.f32.mrb[3].mxu1  ;;  %v539_v26 = vmul.f32 %v707_v22, %v474_v14 }
 0x1da   :  { %v538_v27 = vmul.f32 %v469_v15, %v320_v23 }
 0x1db   :  { %555 = vst [vmem:[%s998_s5 + $0x18] sm:$0xff] %v539_v26 }
 0x1dc   :  { %v710_v28 = vpop.f32.mrb[4].mxu1  ;;  %554 = vst [vmem:[%s998_s5 + $0x10] sm:$0xff] %v538_v27 }
 0x1dd   :  { %v330_v29 = vpop.f32.mrb[5].mxu1  ;;  %v541_v30 = vmul.f32 %v710_v28, %v484_v16 }
 0x1de   :  { %v540_v32 = vmul.f32 %v479_v18, %v330_v29 }
 0x1df   :  { %557 = vst [vmem:[%s998_s5 + $0x28] sm:$0xff] %v541_v30 }
 0x1e0   :  { %v713_v33 = vpop.f32.mrb[6].mxu1  ;;  %556 = vst [vmem:[%s998_s5 + $0x20] sm:$0xff] %v540_v32 }
 0x1e1   :  { %v340_v35 = vpop.f32.mrb[7].mxu1  ;;  %v543_v36 = vmul.f32 %v713_v33, %v494_v24 }
 0x1e2   :  { %v542_v37 = vmul.f32 %v489_v25, %v340_v35 }
 0x1e3   :  { %559 = vst [vmem:[%s998_s5 + $0x38] sm:$0xff] %v543_v36 }
 0x1e4   :  { %v716_v38 = vpop.f32.mrb[8].mxu1  ;;  %558 = vst [vmem:[%s998_s5 + $0x30] sm:$0xff] %v542_v37 }
 0x1e5   :  { %v350_v39 = vpop.f32.mrb[9].mxu1  ;;  %v545_v42 = vmul.f32 %v716_v38, %v504_v31 }
 0x1e6   :  { %v544_v43 = vmul.f32 %v499_v34, %v350_v39 }
 0x1e7   :  { %561 = vst [vmem:[%s998_s5 + $0x48] sm:$0xff] %v545_v42 }
 0x1e8   :  { %v719_v44 = vpop.f32.mrb[10].mxu1  ;;  %560 = vst [vmem:[%s998_s5 + $0x40] sm:$0xff] %v544_v43 }
 0x1e9   :  { %v360_v45 = vpop.f32.mrb[11].mxu1  ;;  %v547_v46 = vmul.f32 %v719_v44, %v514_v40 }
 0x1ea   :  { %v546_v48 = vmul.f32 %v509_v41, %v360_v45 }
 0x1eb   :  { %563 = vst [vmem:[%s998_s5 + $0x58] sm:$0xff] %v547_v46 }
 0x1ec   :  { %v722_v49 = vpop.f32.mrb[12].mxu1  ;;  %562 = vst [vmem:[%s998_s5 + $0x50] sm:$0xff] %v546_v48 }
 0x1ed   :  { %v370_v51 = vpop.f32.mrb[13].mxu1  ;;  %v549_v52 = vmul.f32 %v722_v49, %v524_v47 }
 0x1ee   :  { %v548_v53 = vmul.f32 %v519_v50, %v370_v51 }
 0x1ef   :  { %565 = vst [vmem:[%s998_s5 + $0x68] sm:$0xff] %v549_v52 }
 0x1f0   :  { %v725_v54 = vpop.f32.mrb[14].mxu1  ;;  %564 = vst [vmem:[%s998_s5 + $0x60] sm:$0xff] %v548_v53 }
 0x1f1   :  { %v380_v55 = vpop.f32.mrb[15].mxu1  ;;  %v551_v58 = vmul.f32 %v725_v54, %v534_v56 }
 0x1f2   :  { %v550_v59 = vmul.f32 %v529_v57, %v380_v55 }
 0x1f3   :  { %567 = vst [vmem:[%s998_s5 + $0x78] sm:$0xff] %v551_v58 }
 0x1f4   :  { %566 = vst [vmem:[%s998_s5 + $0x70] sm:$0xff] %v550_v59 }

// kernel: branch_hgcn.4
= control target key start
LH: loop header
LB: loop body
LE: loop exit
PB: predicated region body
PF: predicated region fallthrough
CT: control target
= control target key end

     0   :  { %v970_v3 = vmov 0   ;;  %vm307_vm0 = vcmask 130048   ;;  %s1259_s3 = inlined_call_operand.vmem [shape: f32[128,128], index: 3, kind: input, shape index: {}]   ;;  %s1260_s0 = inlined_call_operand.vmem [shape: bf16[16,128], index: 0, kind: input, shape index: {}]   ;;  %s1261_s2 = inlined_call_operand.vmem [shape: f32[16,1], index: 2, kind: input, shape index: {}]   ;;  %s1262_s6 = inlined_call_operand.vmem [shape: f32[128,1], index: 6, kind: input, shape index: {}]   ;;  %s1263_s5 = inlined_call_operand.vmem [shape: f32[128,128], index: 5, kind: input, shape index: {}]   ;;  %s1264_s4 = inlined_call_operand.vmem [shape: f32[1,128], index: 4, kind: input, shape index: {}]   ;;  %s1265_s1 = inlined_call_operand.vmem [shape: bf16[128,16], index: 1, kind: input, shape index: {}]   ;;  %s1266_s7 = inlined_call_operand.vmem [shape: f32[128,128], index: 7, kind: output, shape index: {}]  }
   0x1   :  { %v52_v0 = vld [vmem:[%s1259_s3] sm:$0xff]  ;;  %v53_v1 = vld [vmem:[%s1259_s3 + $0x8] sm:$0xff]  ;;  %v54_v2 = vld [vmem:[%s1259_s3 + $0x10] sm:$0xff]  ;;  %968 = vset.pattern.permute.xlu0 %v970_v3  ;;  %969 = vset.pattern.permute.xlu1 %v970_v3 }
   0x2   :  { %v896_v4 = vpack.c.bf16 %v53_v1, %v52_v0  ;;  %v55_v5 = vld [vmem:[%s1259_s3 + $0x18] sm:$0xff]  ;;  %v56_v7 = vld [vmem:[%s1259_s3 + $0x20] sm:$0xff]  ;;  %v57_v8 = vld [vmem:[%s1259_s3 + $0x28] sm:$0xff] }
   0x3   :  { %v900_v6 = vpack.c.bf16 %v55_v5, %v54_v2  ;;  %v904_v9 = vpack.c.bf16 %v57_v8, %v56_v7  ;;  %v1032_v10 = vld [vmem:[%s1260_s0] sm:$0xff]   ;;  %v58_v12 = vld [vmem:[%s1259_s3 + $0x30] sm:$0xff]  ;;  %v59_v13 = vld [vmem:[%s1259_s3 + $0x38] sm:$0xff] }
   0x4   :  { %897 = vmatprep.subr.bf16.mxu0 %v896_v4  ;;  %v46_v11 = vld [vmem:[%s1261_s2] sm:$0xff]  ;;  %v703_v14 = vunpack.c.l.bf16 %v1032_v10  ;;  %v47_v15 = vld [vmem:[%s1261_s2 + $0x8] sm:$0xff]  ;;  %v908_v16 = vpack.c.bf16 %v59_v13, %v58_v12  ;;  %v554_v19 = vld [vmem:[%s1262_s6 + $0x10] sm:$0xff]  ;;  %v704_v49 = vunpack.c.h.bf16 %v1032_v10 }
   0x5   :  { %899 = vmatpush3.bf16.msra.mxu0 %v896_v4  ;;  %145 = vperm.xlu0 %968, %v46_v11   ;;  %v60_v17 = vld [vmem:[%s1259_s3 + $0x40] sm:$0xff]  ;;  %v61_v18 = vld [vmem:[%s1259_s3 + $0x48] sm:$0xff]  ;;  %v62_v21 = vld [vmem:[%s1259_s3 + $0x50] sm:$0xff] }
   0x6   :  { %901 = vmatprep.subr.bf16.mxu0 %v900_v6  ;;  %830 = vmatprep.mubr.f32.mxu0 %v703_v14  ;;  %v912_v20 = vpack.c.bf16 %v61_v18, %v60_v17  ;;  %v63_v22 = vld [vmem:[%s1259_s3 + $0x58] sm:$0xff]  ;;  %v166_v23 = vld [vmem:[%s1263_s5] sm:$0xff]  ;;  %v167_v24 = vld [vmem:[%s1263_s5 + $0x8] sm:$0xff] }
   0x7   :  { %v556_v25 = vld [vmem:[%s1262_s6 + $0x20] sm:$0xff]  ;;  %v928_v26 = vpack.c.bf16 %v167_v24, %v166_v23  ;;  %v916_v27 = vpack.c.bf16 %v63_v22, %v62_v21  ;;  %v168_v28 = vld [vmem:[%s1263_s5 + $0x10] sm:$0xff]  ;;  %v169_v29 = vld [vmem:[%s1263_s5 + $0x18] sm:$0xff] }
   0x8   :  { %v64_v30 = vld [vmem:[%s1259_s3 + $0x60] sm:$0xff]  ;;  %v65_v31 = vld [vmem:[%s1259_s3 + $0x68] sm:$0xff]  ;;  %v932_v32 = vpack.c.bf16 %v169_v29, %v168_v28  ;;  %v558_v33 = vld [vmem:[%s1262_s6 + $0x30] sm:$0xff] }
   0x9   :  { %903 = vmatpush3.bf16.msra.mxu0 %v900_v6  ;;  %150 = vperm.xlu0 %968, %v47_v15   ;;  %v920_v34 = vpack.c.bf16 %v65_v31, %v64_v30  ;;  %v170_v35 = vld [vmem:[%s1263_s5 + $0x20] sm:$0xff]  ;;  %v171_v36 = vld [vmem:[%s1263_s5 + $0x28] sm:$0xff]  ;;  %v66_v37 = vld [vmem:[%s1259_s3 + $0x70] sm:$0xff] }
   0xa   :  { %905 = vmatprep.subr.bf16.mxu0 %v904_v9  ;;  %929 = vmatprep.subr.bf16.mxu1 %v928_v26  ;;  %v67_v38 = vld [vmem:[%s1259_s3 + $0x78] sm:$0xff]  ;;  %v936_v39 = vpack.c.bf16 %v171_v36, %v170_v35  ;;  %v560_v40 = vld [vmem:[%s1262_s6 + $0x40] sm:$0xff]  ;;  %v172_v42 = vld [vmem:[%s1263_s5 + $0x30] sm:$0xff] }
   0xb   :  { %931 = vmatpush3.bf16.msra.mxu1 %v928_v26  ;;  %v924_v41 = vpack.c.bf16 %v67_v38, %v66_v37  ;;  %v173_v43 = vld [vmem:[%s1263_s5 + $0x38] sm:$0xff]  ;;  %v562_v45 = vld [vmem:[%s1262_s6 + $0x50] sm:$0xff]  ;;  %v174_v46 = vld [vmem:[%s1263_s5 + $0x40] sm:$0xff] }
   0xc   :  { %933 = vmatprep.subr.bf16.mxu1 %v932_v32  ;;  %v940_v44 = vpack.c.bf16 %v173_v43, %v172_v42  ;;  %v175_v47 = vld [vmem:[%s1263_s5 + $0x48] sm:$0xff]  ;;  %v564_v50 = vld [vmem:[%s1262_s6 + $0x60] sm:$0xff]  ;;  %v176_v51 = vld [vmem:[%s1263_s5 + $0x50] sm:$0xff] }
   0xd   :  { %907 = vmatpush3.bf16.msra.mxu0 %v904_v9  ;;  %580 = vperm.xlu0 %968, %v554_v19   ;;  %v944_v48 = vpack.c.bf16 %v175_v47, %v174_v46  ;;  %v177_v52 = vld [vmem:[%s1263_s5 + $0x58] sm:$0xff]  ;;  %v566_v54 = vld [vmem:[%s1262_s6 + $0x70] sm:$0xff]  ;;  %v178_v55 = vld [vmem:[%s1263_s5 + $0x60] sm:$0xff] }
   0xe   :  { %909 = vmatprep.subr.bf16.mxu0 %v908_v16  ;;  %v948_v53 = vpack.c.bf16 %v177_v52, %v176_v51  ;;  %v179_v56 = vld [vmem:[%s1263_s5 + $0x68] sm:$0xff]  ;;  %v180_v58 = vld [vmem:[%s1263_s5 + $0x70] sm:$0xff]  ;;  %v181_v59 = vld [vmem:[%s1263_s5 + $0x78] sm:$0xff] }
   0xf   :  { %935 = vmatpush3.bf16.msra.mxu1 %v932_v32  ;;  %v952_v57 = vpack.c.bf16 %v179_v56, %v178_v55  ;;  %v956_v60 = vpack.c.bf16 %v181_v59, %v180_v58  ;;  %v684_v0 = vld [vmem:[%s1264_s4] ss:$0 sm:$0xff]  ;;  %v553_v13 = vld [vmem:[%s1262_s6 + $0x8] sm:$0xff]  ;;  %v555_v14 = vld [vmem:[%s1262_s6 + $0x18] sm:$0xff] }
  0x10   :  { %937 = vmatprep.subr.bf16.mxu1 %v936_v39  ;;  %v706_v8 = vld [vmem:[%s1265_s1] sm:$0xff]   ;;  %v557_v15 = vld [vmem:[%s1262_s6 + $0x28] sm:$0xff]  ;;  %v563_v18 = vld [vmem:[%s1262_s6 + $0x58] sm:$0xff] }
  0x11   :  { %911 = vmatpush3.bf16.msra.mxu0 %v908_v16  ;;  %590 = vperm.xlu0 %968, %v556_v25   ;;  %v740_v9 = vld [vmem:[%s1265_s1 + $0x20] sm:$0xff]   ;;  %v707_v10 = vunpack.c.l.bf16 %v706_v8  ;;  %v559_v16 = vld [vmem:[%s1262_s6 + $0x38] sm:$0xff]  ;;  %v561_v17 = vld [vmem:[%s1262_s6 + $0x48] sm:$0xff]  ;;  %v708_v28 = vunpack.c.h.bf16 %v706_v8 }
  0x12   :  { %913 = vmatprep.subr.bf16.mxu0 %v912_v20  ;;  %v723_v11 = vunpack.c.l.bf16 %v740_v9  ;;  %v552_v12 = vld [vmem:[%s1262_s6] sm:$0xff]  ;;  %v565_v19 = vld [vmem:[%s1262_s6 + $0x68] sm:$0xff]  ;;  %v724_v29 = vunpack.c.h.bf16 %v740_v9  ;;  %v738_v32 = vld [vmem:[%s1265_s1 + $0x10] sm:$0xff]  }
  0x13   :  { %939 = vmatpush3.bf16.msra.mxu1 %v936_v39  ;;  %570 = vperm.xlu1 %969, %v552_v12   ;;  %v737_v26 = vld [vmem:[%s1265_s1 + $0x8] sm:$0xff]   ;;  %v715_v36 = vunpack.c.l.bf16 %v738_v32  ;;  %v739_v38 = vld [vmem:[%s1265_s1 + $0x18] sm:$0xff]  }
  0x14   :  { %941 = vmatprep.subr.bf16.mxu1 %v940_v44  ;;  %v711_v30 = vunpack.c.l.bf16 %v737_v26  ;;  %v743_v39 = vld [vmem:[%s1265_s1 + $0x38] sm:$0xff]   ;;  %v719_v42 = vunpack.c.l.bf16 %v739_v38 }
  0x15   :  { %915 = vmatpush3.bf16.msra.mxu0 %v912_v20  ;;  %600 = vperm.xlu0 %968, %v558_v33   ;;  %v567_v20 = vld [vmem:[%s1262_s6 + $0x78] sm:$0xff]  ;;  %v742_v33 = vld [vmem:[%s1265_s1 + $0x30] sm:$0xff]   ;;  %v735_v43 = vunpack.c.l.bf16 %v743_v39 }
  0x16   :  { %917 = vmatprep.subr.bf16.mxu0 %v916_v27  ;;  %v731_v37 = vunpack.c.l.bf16 %v742_v33 }
  0x17   :  { %943 = vmatpush3.bf16.msra.mxu1 %v940_v44  ;;  %575 = vperm.xlu1 %969, %v553_v13   ;;  %v720_v44 = vunpack.c.h.bf16 %v739_v38 }
  0x18   :  { %945 = vmatprep.subr.bf16.mxu1 %v944_v48 }
  0x19   :  { %919 = vmatpush3.bf16.msra.mxu0 %v916_v27  ;;  %610 = vperm.xlu0 %968, %v560_v40   ;;  %v741_v27 = vld [vmem:[%s1265_s1 + $0x28] sm:$0xff]   ;;  %v716_v40 = vunpack.c.h.bf16 %v738_v32 }
  0x1a   :  { %921 = vmatprep.subr.bf16.mxu0 %v920_v34  ;;  %v727_v31 = vunpack.c.l.bf16 %v741_v27  ;;  %v728_v35 = vunpack.c.h.bf16 %v741_v27 }
  0x1b   :  { %947 = vmatpush3.bf16.msra.mxu1 %v944_v48  ;;  %585 = vperm.xlu1 %969, %v555_v14  }
  0x1c   :  { %949 = vmatprep.subr.bf16.mxu1 %v948_v53 }
  0x1d   :  { %923 = vmatpush3.bf16.msra.mxu0 %v920_v34  ;;  %620 = vperm.xlu0 %968, %v562_v45   ;;  %v712_v34 = vunpack.c.h.bf16 %v737_v26  ;;  %v736_v45 = vunpack.c.h.bf16 %v743_v39 }
  0x1e   :  { %925 = vmatprep.subr.bf16.mxu0 %v924_v41 }
  0x1f   :  { %951 = vmatpush3.bf16.msra.mxu1 %v948_v53  ;;  %595 = vperm.xlu1 %969, %v557_v15  }
  0x20   :  { %953 = vmatprep.subr.bf16.mxu1 %v952_v57 }
  0x21   :  { %927 = vmatpush3.bf16.msra.mxu0 %v924_v41  ;;  %630 = vperm.xlu0 %968, %v564_v50   ;;  %v732_v41 = vunpack.c.h.bf16 %v742_v33 }
  0x23   :  { %955 = vmatpush3.bf16.msra.mxu1 %v952_v57  ;;  %605 = vperm.xlu1 %969, %v559_v16  }
  0x24   :  { %831 = vmatmul.mubr.f32.vlgmr.msra.gmra.mrb[0].mxu0 %v704_v49  ;;  %957 = vmatprep.subr.bf16.mxu1 %v956_v60 }
  0x25   :  { %640 = vperm.xlu0 %968, %v566_v54   ;;  %872 = vmatprep.mubr.msk.f32.mxu0 %vm307_vm0, %v707_v10 }
  0x27   :  { %959 = vmatpush3.bf16.msra.mxu1 %v956_v60  ;;  %615 = vperm.xlu1 %969, %v561_v17  }
  0x2b   :  { %625 = vperm.xlu1 %969, %v563_v18  }
  0x2f   :  { %635 = vperm.xlu1 %969, %v565_v19  }
  0x33   :  { %645 = vperm.xlu1 %969, %v567_v20  }
  0x84   :  { %v146_v61 = vpop.permute.xlu0 %145 }
  0x88   :  { %v151_v62 = vpop.permute.xlu0 %150 }
  0x8c   :  { %v581_v48 = vpop.permute.xlu0 %580 }
  0x90   :  { %v591_v50 = vpop.permute.xlu0 %590 }
  0x92   :  { %v571_v46 = vpop.permute.xlu1 %570 }
  0x94   :  { %v601_v52 = vpop.permute.xlu0 %600 }
  0x96   :  { %v576_v47 = vpop.permute.xlu1 %575 }
  0x98   :  { %v611_v54 = vpop.permute.xlu0 %610 }
  0x9a   :  { %v586_v49 = vpop.permute.xlu1 %585 }
  0x9c   :  { %v621_v56 = vpop.permute.xlu0 %620 }
  0x9e   :  { %v596_v51 = vpop.permute.xlu1 %595 }
  0xa2   :  { %v606_v53 = vpop.permute.xlu1 %605 }
  0xa6   :  { %v616_v55 = vpop.permute.xlu1 %615 }
  0xaa   :  { %v626_v57 = vpop.permute.xlu1 %625 }
  0xf7   :  { %v832_v63 = vpop.f32.mrb[0].mxu0 }
  0xf8   :  { %v154_v1 = vmul.f32 %v832_v63, %v151_v62  ;;  %v134_v2 = vpop.f32.mrb[1].mxu0 }
  0xf9   :  { %v153_v3 = vmul.f32 %v146_v61, %v134_v2 }
  0xfa   :  { %v163_v4 = vadd.f32 %v684_v0, %v154_v1 }
  0xfb   :  { %v162_v5 = vadd.f32 %v684_v0, %v153_v3 }
  0xfc   :  { %v165_v7 = vmax.f32 %v163_v4, 0.0 }
  0xfd   :  { %v164_v6 = vmax.f32 %v162_v5, 0.0 }
  0xff   :  { %865 = vmatprep.mubr.f32.mxu1 %v164_v6  ;;  %v631_v6 = vpop.permute.xlu0 %630 }
 0x100   :  { %866 = vmatmul.mubr.f32.vlgmr.msra.gmra.mrb[0].mxu1 %v165_v7  ;;  %v636_v7 = vpop.permute.xlu1 %635 }
 0x101   :  { %884 = vmatprep.mubr.msk.f32.mxu1 %vm307_vm0, %v723_v11 }
 0x1d3   :  { %v867_v21 = vpop.f32.mrb[0].mxu1 }
 0x1d4   :  { %v258_v22 = vmul.f32 %v867_v21, %v151_v62  ;;  %v248_v23 = vpop.f32.mrb[1].mxu1 }
 0x1d5   :  { %v257_v24 = vmul.f32 %v248_v23, %v146_v61 }
 0x1d7   :  { %v960_v25 = vpack.c.bf16 %v258_v22, %v257_v24  ;;  %v646_v24 = vpop.permute.xlu1 %645 }
 0x1d9   :  { %961 = vmatprep.subr.bf16.mxu0 %v960_v25  ;;  %964 = vmatprep.subr.bf16.mxu1 %v960_v25 }
 0x1da   :  { %963 = vmatpush3.bf16.msra.mxu0 %v960_v25  ;;  %965 = vmatpush3.bf16.msra.mxu1 %v960_v25  ;;  %v641_v25 = vpop.permute.xlu0 %640 }
 0x1dd   :  { %873 = vmatmul.mubr.msk.f32.vlgmr.msra.gmra.mrb[2].mxu0 %vm307_vm0, %v708_v28  ;;  %885 = vmatmul.mubr.msk.f32.vlgmr.msra.gmra.mrb[2].mxu1 %vm307_vm0, %v724_v29 }
 0x1de   :  { %875 = vmatprep.mubr.msk.f32.mxu0 %vm307_vm0, %v711_v30  ;;  %887 = vmatprep.mubr.msk.f32.mxu1 %vm307_vm0, %v727_v31 }
 0x1e1   :  { %876 = vmatmul.mubr.msk.f32.gmra.mrb[4].mxu0 %vm307_vm0, %v712_v34  ;;  %888 = vmatmul.mubr.msk.f32.gmra.mrb[4].mxu1 %vm307_vm0, %v728_v35 }
 0x1e2   :  { %878 = vmatprep.mubr.msk.f32.mxu0 %vm307_vm0, %v715_v36  ;;  %890 = vmatprep.mubr.msk.f32.mxu1 %vm307_vm0, %v731_v37 }
 0x1e5   :  { %879 = vmatmul.mubr.msk.f32.gmra.mrb[6].mxu0 %vm307_vm0, %v716_v40  ;;  %891 = vmatmul.mubr.msk.f32.gmra.mrb[6].mxu1 %vm307_vm0, %v732_v41 }
 0x1e6   :  { %881 = vmatprep.mubr.msk.f32.mxu0 %vm307_vm0, %v719_v42  ;;  %893 = vmatprep.mubr.msk.f32.mxu1 %vm307_vm0, %v735_v43 }
 0x1e9   :  { %882 = vmatmul.mubr.msk.f32.gmra.mrb[8].mxu0 %vm307_vm0, %v720_v44  ;;  %894 = vmatmul.mubr.msk.f32.gmra.mrb[8].mxu1 %vm307_vm0, %v736_v45 }
 0x2b0   :  { %v874_v58 = vpop.f32.mrb[2].mxu0  ;;  %v886_v59 = vpop.f32.mrb[2].mxu1 }
 0x2b1   :  { %v422_v60 = vpop.f32.mrb[3].mxu0  ;;  %v462_v61 = vpop.f32.mrb[3].mxu1  ;;  %v649_v62 = vmul.f32 %v874_v58, %v576_v47  ;;  %v657_v63 = vmul.f32 %v886_v59, %v616_v55 }
 0x2b2   :  { %v648_v0 = vmul.f32 %v571_v46, %v422_v60  ;;  %v656_v1 = vmul.f32 %v611_v54, %v462_v61 }
 0x2b3   :  { %665 = vst [vmem:[%s1266_s7 + $0x8] sm:$0xff] %v649_v62  ;;  %673 = vst [vmem:[%s1266_s7 + $0x48] sm:$0xff] %v657_v63 }
 0x2b4   :  { %v877_v2 = vpop.f32.mrb[4].mxu0  ;;  %v889_v3 = vpop.f32.mrb[4].mxu1  ;;  %664 = vst [vmem:[%s1266_s7] sm:$0xff] %v648_v0  ;;  %672 = vst [vmem:[%s1266_s7 + $0x40] sm:$0xff] %v656_v1 }
 0x2b5   :  { %v432_v4 = vpop.f32.mrb[5].mxu0  ;;  %v472_v5 = vpop.f32.mrb[5].mxu1  ;;  %v651_v8 = vmul.f32 %v877_v2, %v586_v49  ;;  %v659_v9 = vmul.f32 %v889_v3, %v626_v57 }
 0x2b6   :  { %v650_v10 = vmul.f32 %v581_v48, %v432_v4  ;;  %v658_v11 = vmul.f32 %v621_v56, %v472_v5 }
 0x2b7   :  { %667 = vst [vmem:[%s1266_s7 + $0x18] sm:$0xff] %v651_v8  ;;  %675 = vst [vmem:[%s1266_s7 + $0x58] sm:$0xff] %v659_v9 }
 0x2b8   :  { %v880_v12 = vpop.f32.mrb[6].mxu0  ;;  %v892_v13 = vpop.f32.mrb[6].mxu1  ;;  %666 = vst [vmem:[%s1266_s7 + $0x10] sm:$0xff] %v650_v10  ;;  %674 = vst [vmem:[%s1266_s7 + $0x50] sm:$0xff] %v658_v11 }
 0x2b9   :  { %v442_v14 = vpop.f32.mrb[7].mxu0  ;;  %v482_v15 = vpop.f32.mrb[7].mxu1  ;;  %v653_v16 = vmul.f32 %v880_v12, %v596_v51  ;;  %v661_v17 = vmul.f32 %v892_v13, %v636_v7 }
 0x2ba   :  { %v652_v18 = vmul.f32 %v591_v50, %v442_v14  ;;  %v660_v19 = vmul.f32 %v631_v6, %v482_v15 }
 0x2bb   :  { %669 = vst [vmem:[%s1266_s7 + $0x28] sm:$0xff] %v653_v16  ;;  %677 = vst [vmem:[%s1266_s7 + $0x68] sm:$0xff] %v661_v17 }
 0x2bc   :  { %v883_v20 = vpop.f32.mrb[8].mxu0  ;;  %v895_v21 = vpop.f32.mrb[8].mxu1  ;;  %668 = vst [vmem:[%s1266_s7 + $0x20] sm:$0xff] %v652_v18  ;;  %676 = vst [vmem:[%s1266_s7 + $0x60] sm:$0xff] %v660_v19 }
 0x2bd   :  { %v452_v22 = vpop.f32.mrb[9].mxu0  ;;  %v492_v23 = vpop.f32.mrb[9].mxu1  ;;  %v655_v26 = vmul.f32 %v883_v20, %v606_v53  ;;  %v663_v27 = vmul.f32 %v895_v21, %v646_v24 }
 0x2be   :  { %v654_v28 = vmul.f32 %v601_v52, %v452_v22  ;;  %v662_v29 = vmul.f32 %v641_v25, %v492_v23 }
 0x2bf   :  { %671 = vst [vmem:[%s1266_s7 + $0x38] sm:$0xff] %v655_v26  ;;  %679 = vst [vmem:[%s1266_s7 + $0x78] sm:$0xff] %v663_v27 }
 0x2c0   :  { %670 = vst [vmem:[%s1266_s7 + $0x30] sm:$0xff] %v654_v28  ;;  %678 = vst [vmem:[%s1266_s7 + $0x70] sm:$0xff] %v662_v29 }

</bundles_post_ra>
